<compile_context>
chip_gen: v6e
topology: v6e:2x2x1
jax: 0.10.0
libtpu: 0.0.40
codegen_flags: <defaults>
</compile_context>

<pallas_src>
import jax
import jax.numpy as jnp
from jax.experimental import pallas as pl
from jax.experimental.pallas import tpu as pltpu

_TM_MAX = 131072     # lanes per row tile; total VMEM ~128*TM bytes (~16 MiB)
_MIN_GRID = 4        # aim for >=4 grid steps on large N (lets TCs split work)
_PALLAS_MIN_N = 4096  # below this, plain XLA beats the pallas_call launch cost


def _linear_kernel(xt_ref, w_ref, o_ref):
    # xt_ref: (F, TM) block of x^T, w_ref: (F, 1), o_ref: (1, TM)
    # VPU lane-broadcast multiply + F-deep sublane reduce; the (1, TM) result
    # is lane-dense so the store is a plain (unmasked) vst. No MXU needed.
    o_ref[...] = jnp.sum(xt_ref[...] * w_ref[...], axis=0, keepdims=True)


def _pick_tile(n):
    """Lane-aligned row tile giving >= _MIN_GRID steps for large N."""
    if n <= 1024:
        return n  # single full-array block (bypasses the (8,128) rule)
    target = -(-n // _MIN_GRID)                       # cdiv(n, _MIN_GRID)
    return min(_TM_MAX, max(128, ((target + 127) // 128) * 128))


def _linear_cls_pallas(x_t, w_t, n):
    """x_t: [F, N] float32 (lane-dense layout), w_t: [F, 1] -> [N] float32."""
    f, n_cols = x_t.shape
    assert n_cols == n and w_t.shape == (f, 1)

    tm = _pick_tile(n)
    grid = (pl.cdiv(n, tm),)   # ragged last block handled by Pallas (no pad)

    out = pl.pallas_call(
        _linear_kernel,
        out_shape=jax.ShapeDtypeStruct((1, n), jnp.float32),
        grid=grid,
        in_specs=[
            pl.BlockSpec((f, tm), lambda i: (0, i)),   # x^T row tile
            pl.BlockSpec((f, 1), lambda i: (0, 0)),    # weight (resident)
        ],
        out_specs=pl.BlockSpec((1, tm), lambda i: (0, i)),  # lane-dense output
        compiler_params=pltpu.CompilerParams(
            dimension_semantics=("parallel",),   # shard row steps across TCs
            vmem_limit_bytes=48 << 20,           # headroom for 128K-lane tiles
        ),
    )(x_t, w_t)

    # nn.Flatten(0): [1, N] -> [N]
    return out[0]


def linear_cls_forward(x, w_t):
    """x: [N, F] float32 (proxy.x), w_t: [F, 1] float32 (torch weight [1, F].T)
    -> [N] float32, matching Linear(F, 1, bias=False) + Flatten(0)."""
    n, f = x.shape
    assert w_t.shape == (f, 1)
    if n < _PALLAS_MIN_N:
        # Tiny inputs: let XLA fuse the trivial matvec; avoids kernel launch cost.
        return (x @ w_t).reshape(-1)
    # TODO(synk): the standalone x.T relayout is an extra HBM pass on a purely
    # memory-bound op; producers that can emit x in [F, N] layout should call
    # _linear_cls_pallas directly and skip it.
    return _linear_cls_pallas(x.T, w_t, n)


if __name__ == "__main__":
    key = jax.random.PRNGKey(0)
    k_x, k_w, k_x2 = jax.random.split(key, 3)

    # proxy.x : [batch=8, in_features=4]  (small shape consistent with the module)
    x = jax.random.normal(k_x, (8, 4), dtype=jnp.float32)

    # Deterministic Linear(4, 1, bias=False) weight, torch shape [1, 4].
    bound = 1.0 / (4.0 ** 0.5)  # torch default uniform(-1/sqrt(fan_in), ...)
    w = jax.random.uniform(k_w, (1, 4), dtype=jnp.float32,
                           minval=-bound, maxval=bound)
    w_t = w.T  # [4, 1]

    # Run the Pallas kernel once on the demo shape (the dispatcher would route
    # N=8 to the fused-XLA fallback, but we exercise the kernel explicitly).
    y = jax.block_until_ready(_linear_cls_pallas(x.T, w_t, x.shape[0]))
    y_ref = (x @ w_t).reshape(-1)
    assert y.shape == (8,)
    assert jnp.allclose(y, y_ref, atol=1e-5, rtol=1e-5)

    # Also exercise the tiled path with a ragged last block (grid > 1, no pad).
    x2 = jax.random.normal(k_x2, (3000, 4), dtype=jnp.float32)
    y2 = jax.block_until_ready(_linear_cls_pallas(x2.T, w_t, x2.shape[0]))
    y2_ref = (x2 @ w_t).reshape(-1)
    assert y2.shape == (3000,)
    assert jnp.allclose(y2, y2_ref, atol=1e-5, rtol=1e-5)

    # Full module forward (with small-N fallback) matches the reference too.
    yf = jax.block_until_ready(linear_cls_forward(x, w_t))
    assert jnp.allclose(yf, y_ref, atol=1e-5, rtol=1e-5)

    print("KERNEL_OK")
</pallas_src>

<mosaic_0001>
module attributes {stable_mosaic.version = 11 : i64} {
  func.func @_linear_kernel(%arg0: i32, %arg1: memref<4x8xf32, #tpu.memory_space<vmem>>, %arg2: memref<4x1xf32, #tpu.memory_space<vmem>>, %arg3: memref<1x8xf32, #tpu.memory_space<vmem>>) attributes {dimension_semantics = [#tpu.dimension_semantics<parallel>], iteration_bounds = array<i64: 1>, scalar_prefetch = 0 : i64, scratch_operands = 0 : i64, tpu.core_type = #tpu.core_type<tc>, window_params = [{transform_indices = @transform_0, window_bounds = array<i64: 4, 8>}, {pipeline_mode = #tpu.pipeline_mode<synchronous>, transform_indices = @transform_1, window_bounds = array<i64: 4, 1>}, {transform_indices = @transform_2, window_bounds = array<i64: 1, 8>}]} {
    %c0 = arith.constant 0 : index
    %c0_0 = arith.constant 0 : index
    %0 = vector.load %arg1[%c0, %c0_0] : memref<4x8xf32, #tpu.memory_space<vmem>>, vector<4x8xf32>
    %c0_1 = arith.constant 0 : index
    %c0_2 = arith.constant 0 : index
    %1 = vector.load %arg2[%c0_1, %c0_2] : memref<4x1xf32, #tpu.memory_space<vmem>>, vector<4x1xf32>
    %2 = vector.broadcast %1 : vector<4x1xf32> to vector<4x8xf32>
    %3 = arith.mulf %0, %2 : vector<4x8xf32>
    %cst = arith.constant dense<0.000000e+00> : vector<8xf32>
    %4 = vector.multi_reduction <add>, %3, %cst [0] : vector<4x8xf32> to vector<8xf32>
    %5 = vector.shape_cast %4 : vector<8xf32> to vector<1x8xf32>
    %c0_3 = arith.constant 0 : index
    %c0_4 = arith.constant 0 : index
    %6 = vector.load %arg3[%c0_3, %c0_4] : memref<1x8xf32, #tpu.memory_space<vmem>>, vector<1x8xf32>
    tpu.vector_store %arg3[%c0_3, %c0_4], %5 {strides = array<i32>} : memref<1x8xf32, #tpu.memory_space<vmem>>, vector<1x8xf32>,
    return
  }
  func.func @transform_0(%arg0: i32) -> (i32, i32) {
    %c0_i32 = arith.constant 0 : i32
    %c0_i32_0 = arith.constant 0 : i32
    return %c0_i32, %arg0 : i32, i32
  }
  func.func @transform_1(%arg0: i32) -> (i32, i32) {
    %c0_i32 = arith.constant 0 : i32
    %c0_i32_0 = arith.constant 0 : i32
    %c0_i32_1 = arith.constant 0 : i32
    return %c0_i32, %c0_i32_0 : i32, i32
  }
  func.func @transform_2(%arg0: i32) -> (i32, i32) {
    %c0_i32 = arith.constant 0 : i32
    %c0_i32_0 = arith.constant 0 : i32
    return %c0_i32, %arg0 : i32, i32
  }
}

</mosaic_0001>

<bundles_post_ra>
// kernel: tpu_custom_call.1
= control target key start
LH: loop header
LB: loop body
LE: loop exit
PB: predicated region body
PF: predicated region fallthrough
CT: control target
= control target key end

     0   :  { %v69_v1 = vmov 0   ;;  %s95_s0 = inlined_call_operand.vmem [shape: f32[4,8], index: 0, kind: input, shape index: {}]   ;;  %s96_s1 = inlined_call_operand.vmem [shape: f32[4,1], index: 1, kind: input, shape index: {}]   ;;  %s97_s2 = inlined_call_operand.hbm [shape: f32[1,8], index: 2, kind: output, shape index: {}]  }
   0x1   :  { %v13_v0 = vld [vmem:[%s96_s1] sm:$0xf]  ;;  %46 = vset.pattern.permute.xlu0 %v69_v1 }
   0x2   :  { %7 = vsyncpa [#allocation3], 0  ;;  %16 = vperm.xlu0 %46, %v13_v0   ;;  %v12_v2 = vld [vmem:[%s95_s0] sm:$0xf]  ;;  %vm20_vm0 = vcmask 60416   ;;  %s70_s13 = smov [#allocation2]  }
   0x3   :  { %s36_s14 = sshll.u32 %s70_s13, 4  ;;  %vm28_vm1 = vcmask 57344   ;;  %s37_s14 = int_to_ptr.vmem [resolvable:$true] %s36_s14 }
   0x4   :  { %s47_s1 = scalar_lea.vmem %s37_s14, 16  ;;  %s51_s15 = scalar_lea.vmem %s37_s14, 32 }
   0x5   :  { %p48_p0 = scmp.ne.s32.totalorder %s37_s14, %s47_s1  ;;  %p52_p1 = scmp.lt.s32.totalorder %s37_s14, %s37_s14 }
   0x6   :  { %p53_p2 = scmp.lt.s32.totalorder %s51_s15, %s47_s1 }
   0x8   :  { %p54_p3 = por %p53_p2, %p52_p1 }
   0xa   :  { %p55_p4 = pnand %p54_p3, %p48_p0 }
  0x7d   :  { %v17_v3 = vpop.permute.xlu0 %16 }
  0x7e   :  { %v19_v4 = vmul.f32 %v17_v3, %v12_v2 }
  0x80   :  { %v21_v5 = vsel %vm20_vm0, %v19_v4, 0.0 }
  0x81   :  { %v22_v6 = vrot.slane %v21_v5, 4 }
  0x83   :  { %v23_v7 = vadd.f32 %v22_v6, %v21_v5 }
  0x85   :  { %v24_v8 = vrot.slane %v23_v7, 2 }
  0x87   :  { %v25_v9 = vadd.f32 %v24_v8, %v23_v7 }
  0x89   :  { %v26_v10 = vrot.slane %v25_v9, 1 }
  0x8b   :  { %v27_v11 = vadd.f32 %v26_v10, %v25_v9 }
  0x8d   :  { %29 = vst.msk [vmem:[#allocation2] sm:$0x1] %vm28_vm1, %v27_v11 }
  0x8e   :  { %58 = shalt.err (!%p55_p4)
}
  0x8f   :  { %39 = dma.vmem_to_hbm [thread:$0]  %s37_s14, 16, %s97_s2, [#allocation3]  }
  0x90   :  { %67 = dma.done.wait [#allocation3], 16  }
  0x91   :  { %68 = vsyncadd [#allocation3], 4294967280 }
  0x92   :  { %43 = vsyncpa [#allocation3], 1 }

</bundles_post_ra>
